<compile_context>
chip_gen: v6e
topology: v6e:2x2x1
jax: 0.10.0
libtpu: 0.0.40
codegen_flags: <defaults>
</compile_context>

<pallas_src>
import functools

import jax
import jax.numpy as jnp
from jax import lax
from jax.experimental import pallas as pl
from jax.experimental.pallas import tpu as pltpu

_LANE = 128
_SUBLANE = 8


def _round_up(x, d):
    return (x + d - 1) // d * d


def _cdiv(a, b):
    return (a + b - 1) // b


def _chip_params():
    """Best-effort per-generation tuning.

    Returns (num_tensorcores_sharing_grid, per_array_block_bytes, vmem_limit_bytes).
    """
    kind = ""
    try:
        kind = jax.devices()[0].device_kind.lower()
    except Exception:
        pass
    vmem_cap = None
    try:
        info = pltpu.get_tpu_info()
        for attr in ("vmem_capacity_bytes", "vmem_bytes", "vmem_size_bytes"):
            v = getattr(info, attr, None)
            if v:
                vmem_cap = int(v)
                break
    except Exception:
        pass

    if "v7" in kind:
        gen = "v7x"
    elif any(s in kind for s in ("v6", "v5e", "v5 lite", "lite")):
        gen = "v5e6e"
    elif vmem_cap is not None:
        # v7x exposes 64 MiB VMEM per core; v5e/v6e expose 128 MiB.
        gen = "v7x" if vmem_cap <= (96 << 20) else "v5e6e"
    else:
        gen = "unknown"

    if gen == "v7x":       # 2 TCs / chip, 64 MiB VMEM per core, 3.2 TB/s HBM
        return 2, 2 << 20, 48 << 20
    if gen == "v5e6e":     # 1 TC, 128 MiB VMEM
        return 1, 4 << 20, 64 << 20
    return 1, 2 << 20, 32 << 20   # conservative fallback (unknown chip / interpret)


# --------------------------------------------------------------------------- #
# Kernels
# --------------------------------------------------------------------------- #
def _standardize_fused_kernel(min_stdv, inv_nm1, has_yvar, *refs):
    """Single pass over a full-n column block: stats + normalization.

    Kernel view is 2-D (n, TL).  Padded lanes of a partial last block contain
    garbage, but every column is fully independent, so garbage never
    contaminates real columns and its (masked) outputs are discarded.
    """
    if has_yvar:
        y_ref, yvar_ref, ytf_ref, yvartf_ref, stats_ref = refs
    else:
        y_ref, ytf_ref, stats_ref = refs
        yvar_ref = yvartf_ref = None

    y = y_ref[...].astype(jnp.float32)                       # (n, TL)
    mean = jnp.mean(y, axis=0, keepdims=True)                # (1, TL)
    diff = y - mean                                          # `y` dead from here on
    # unbiased (ddof=1) variance; n == 1 -> var == 0 -> std replaced by 1.0 below.
    var = jnp.sum(diff * diff, axis=0, keepdims=True) * jnp.float32(inv_nm1)
    std = jnp.sqrt(var)
    std = jnp.where(std >= jnp.float32(min_stdv), std, jnp.ones_like(std))

    # One exact reciprocal on the tiny (1, TL) vector; the big tiles only see
    # VPU multiplies.
    inv = pl.reciprocal(std)
    ytf_ref[...] = (diff * inv).astype(ytf_ref.dtype)
    if has_yvar:
        yvartf_ref[...] = (yvar_ref[...].astype(jnp.float32) * (inv * inv)
                           ).astype(yvartf_ref.dtype)

    # Two direct row writes (no sublane-interleaving concatenate).
    stats_ref[0:1, :] = mean
    stats_ref[1:2, :] = std


def _stats_reduce_kernel(n_rows, tn, min_stdv, inv_nm1, k_axis, y_ref, stats_ref):
    """n-chunked sum / sum-of-squares reduction; finalizes mean/std at last chunk.

    The stats output block is resident across the innermost ("arbitrary") n axis
    and doubles as the accumulator.  Tail rows of a partial last chunk are
    masked to zero so they never contaminate real columns.
    """
    k = pl.program_id(k_axis)

    @pl.when(k == 0)
    def _():
        stats_ref[...] = jnp.zeros_like(stats_ref)

    y = y_ref[...].astype(jnp.float32)                       # (tn, TL)
    row = lax.broadcasted_iota(jnp.int32, y.shape, 0) + k * tn
    y = jnp.where(row < n_rows, y, 0.0)                      # mask padded tail rows
    stats_ref[0:1, :] += jnp.sum(y, axis=0, keepdims=True)
    stats_ref[1:2, :] += jnp.sum(y * y, axis=0, keepdims=True)

    @pl.when(k == pl.num_programs(k_axis) - 1)
    def _():
        s = stats_ref[0:1, :]
        mean = s * jnp.float32(1.0 / n_rows)
        var = jnp.maximum(stats_ref[1:2, :] - s * mean, 0.0) * jnp.float32(inv_nm1)
        std = jnp.sqrt(var)
        std = jnp.where(std >= jnp.float32(min_stdv), std, jnp.ones_like(std))
        stats_ref[0:1, :] = mean
        stats_ref[1:2, :] = std


def _standardize_apply_kernel(has_yvar, *refs):
    """Elementwise normalization given precomputed stats (chunked-n path)."""
    if has_yvar:
        y_ref, yvar_ref, stats_ref, ytf_ref, yvartf_ref = refs
    else:
        y_ref, stats_ref, ytf_ref = refs
        yvar_ref = yvartf_ref = None

    mean = stats_ref[0:1, :]
    inv = pl.reciprocal(stats_ref[1:2, :])
    ytf_ref[...] = ((y_ref[...].astype(jnp.float32) - mean) * inv).astype(ytf_ref.dtype)
    if has_yvar:
        yvartf_ref[...] = (yvar_ref[...].astype(jnp.float32) * (inv * inv)
                           ).astype(yvartf_ref.dtype)


# --------------------------------------------------------------------------- #
# Wrapper
# --------------------------------------------------------------------------- #
def standardize_forward(Y, Yvar=None, *, min_stdv=1e-8,
                        force_chunked_n=False, n_block=None):
    """Pallas implementation of Standardize.forward (training mode).

    Args:
      Y:    (batch..., n, m) training targets.
      Yvar: optional (batch..., n, m) observation noise.
      force_chunked_n / n_block: force / size the large-n chunked path (testing).

    Returns:
      (Y_tf, Yvar_tf_or_None, means, stdvs).  Y_tf/Yvar_tf keep the input dtype;
      means/stdvs are float32 with shape (batch..., 1, m).
    """
    batch_shape = Y.shape[:-2]
    n, m = int(Y.shape[-2]), int(Y.shape[-1])
    B = 1
    for d in batch_shape:
        B *= int(d)
    has_yvar = Yvar is not None

    num_tc, block_bytes, vmem_limit = _chip_params()
    isz_y = jnp.dtype(Y.dtype).itemsize
    isz_v = jnp.dtype(Yvar.dtype).itemsize if has_yvar else 0
    inv_nm1 = 1.0 / float(max(n - 1, 1))
    vmem_budget = int(vmem_limit * 0.8)

    # ---- layout: keep native (B, n, m) when the last dim is lane-friendly; only
    # fall back to the (n, B*m) transpose for small m.  No jnp.pad anywhere —
    # Pallas masks partial lane blocks; padded-lane columns are independent and
    # their garbage stats are discarded (masked stores / wrapper slicing).
    native = m >= _LANE
    if native:
        lanes = m
        y_in = Y.reshape(B, n, m)
        yv_in = Yvar.reshape(B, n, m) if has_yvar else None
    else:
        lanes = B * m
        y_in = jnp.swapaxes(Y.reshape(B, n, m), 0, 1).reshape(n, lanes)
        yv_in = (jnp.swapaxes(Yvar.reshape(B, n, m), 0, 1).reshape(n, lanes)
                 if has_yvar else None)
    inputs = [y_in] + ([yv_in] if has_yvar else [])

    # VMEM per lane-column of the fused (full-n) kernel: double-buffered ins and
    # outs (+ Yvar) plus ~2 full-tile f32 temporaries in the body.
    fused_per_lane = n * (4 * isz_y + (4 * isz_v if has_yvar else 0) + 8)
    use_chunked = force_chunked_n or (fused_per_lane * _LANE > vmem_budget)

    if not use_chunked:
        # ----------------------- fused single-pass path -----------------------
        if lanes <= _LANE:
            TL = lanes                              # full-dim (masked) lane block
        else:
            tl_cap = max(_LANE, (block_bytes // max(n * isz_y, 1)) // _LANE * _LANE)
            tl_fit = max(_LANE, (vmem_budget // max(fused_per_lane, 1)) // _LANE * _LANE)
            TL = min(tl_cap, tl_fit, _round_up(lanes, _LANE))
            if num_tc == 2:
                # v7x megacore: keep >= 4 parallel steps (>= 2 per core) so each
                # TensorCore still has a next block to double-buffer against.
                # On single-TC v5e/v6e we keep one big tile instead.
                # TODO(synk): verify with a profile that "parallel" shards the
                # grid across both v7x cores; otherwise switch to CORE_PARALLEL.
                other = B if native else 1
                need_cols = _cdiv(4, max(other, 1))
                if need_cols > 1 and _cdiv(lanes, TL) < need_cols:
                    TL = max(_LANE, _round_up(_cdiv(lanes, need_cols), _LANE))
        col_steps = _cdiv(lanes, TL)

        if native:
            grid = (B, col_steps)
            io_spec = pl.BlockSpec((pl.Squeezed(), n, TL), lambda b, j: (b, 0, j))
            st_spec = pl.BlockSpec((pl.Squeezed(), 2, TL), lambda b, j: (b, 0, j))
            big_shape, stats_shape = (B, n, m), (B, 2, m)
            dims = ("parallel", "parallel")
        else:
            grid = (col_steps,)
            io_spec = pl.BlockSpec((n, TL), lambda j: (0, j))
            st_spec = pl.BlockSpec((2, TL), lambda j: (0, j))
            big_shape, stats_shape = (n, lanes), (2, lanes)
            dims = ("parallel",)

        out_shape = [jax.ShapeDtypeStruct(big_shape, Y.dtype)]
        out_specs = [io_spec]
        if has_yvar:
            out_shape.append(jax.ShapeDtypeStruct(big_shape, Yvar.dtype))
            out_specs.append(io_spec)
        out_shape.append(jax.ShapeDtypeStruct(stats_shape, jnp.float32))
        out_specs.append(st_spec)

        cost = pl.CostEstimate(
            flops=6 * n * lanes,
            transcendentals=2 * lanes,
            bytes_accessed=n * lanes * 2 * (isz_y + isz_v) + 2 * lanes * 4,
        )
        kernel = functools.partial(_standardize_fused_kernel,
                                   float(min_stdv), inv_nm1, has_yvar)
        outs = pl.pallas_call(
            kernel,
            out_shape=tuple(out_shape),
            grid_spec=pltpu.PrefetchScalarGridSpec(
                num_scalar_prefetch=0, grid=grid,
                in_specs=[io_spec] * len(inputs), out_specs=out_specs),
            compiler_params=pltpu.CompilerParams(
                dimension_semantics=dims, vmem_limit_bytes=vmem_limit),
            cost_estimate=cost,
        )(*inputs)

        ytf_big = outs[0]
        yvtf_big = outs[1] if has_yvar else None
        stats = outs[-1]

    else:
        # --------- large-n path: chunked reduction + elementwise apply ---------
        if lanes < _LANE:
            TL = lanes
        else:
            TL = min(4 * _LANE, _round_up(lanes, _LANE))
        if n_block is not None:
            tn = int(_round_up(int(n_block), _SUBLANE))
        else:
            apply_per_row = max(TL, _LANE) * (4 * isz_y
                                              + (4 * isz_v if has_yvar else 0) + 8)
            tn_cap = max(_SUBLANE, (block_bytes // max(max(TL, _LANE) * isz_y, 1))
                         // _SUBLANE * _SUBLANE)
            tn_fit = max(_SUBLANE, (vmem_budget // max(apply_per_row, 1))
                         // _SUBLANE * _SUBLANE)
            tn = int(min(tn_cap, tn_fit, _round_up(n, _SUBLANE)))
        n_steps = _cdiv(n, tn)
        col_steps = _cdiv(lanes, TL)

        if native:
            grid = (B, col_steps, n_steps)
            y_spec = pl.BlockSpec((pl.Squeezed(), tn, TL), lambda b, j, k: (b, k, j))
            st_spec = pl.BlockSpec((pl.Squeezed(), 2, TL), lambda b, j, k: (b, 0, j))
            big_shape, stats_shape = (B, n, m), (B, 2, m)
            red_dims = ("parallel", "parallel", "arbitrary")
            app_dims = ("parallel", "parallel", "parallel")
            k_axis = 2
        else:
            grid = (col_steps, n_steps)
            y_spec = pl.BlockSpec((tn, TL), lambda j, k: (k, j))
            st_spec = pl.BlockSpec((2, TL), lambda j, k: (0, j))
            big_shape, stats_shape = (n, lanes), (2, lanes)
            red_dims = ("parallel", "arbitrary")
            app_dims = ("parallel", "parallel")
            k_axis = 1

        reduce_kernel = functools.partial(
            _stats_reduce_kernel, n, tn, float(min_stdv), inv_nm1, k_axis)
        stats = pl.pallas_call(
            reduce_kernel,
            out_shape=jax.ShapeDtypeStruct(stats_shape, jnp.float32),
            grid_spec=pltpu.PrefetchScalarGridSpec(
                num_scalar_prefetch=0, grid=grid,
                in_specs=[y_spec], out_specs=st_spec),
            compiler_params=pltpu.CompilerParams(
                dimension_semantics=red_dims, vmem_limit_bytes=vmem_limit),
        )(y_in)

        apply_kernel = functools.partial(_standardize_apply_kernel, has_yvar)
        app_in_specs = [y_spec] + ([y_spec] if has_yvar else []) + [st_spec]
        app_out_shape = [jax.ShapeDtypeStruct(big_shape, Y.dtype)]
        app_out_specs = [y_spec]
        if has_yvar:
            app_out_shape.append(jax.ShapeDtypeStruct(big_shape, Yvar.dtype))
            app_out_specs.append(y_spec)
        outs = pl.pallas_call(
            apply_kernel,
            out_shape=tuple(app_out_shape),
            grid_spec=pltpu.PrefetchScalarGridSpec(
                num_scalar_prefetch=0, grid=grid,
                in_specs=app_in_specs, out_specs=app_out_specs),
            compiler_params=pltpu.CompilerParams(
                dimension_semantics=app_dims, vmem_limit_bytes=vmem_limit),
        )(*(inputs + [stats]))

        if has_yvar:
            ytf_big, yvtf_big = outs[0], outs[1]
        else:
            ytf_big = outs[0] if isinstance(outs, (tuple, list)) else outs
            yvtf_big = None

    # ---- unpack back to (batch..., n, m) / (batch..., 1, m) ----
    if native:
        Y_tf = ytf_big.reshape(*batch_shape, n, m)
        Yvar_tf = yvtf_big.reshape(*batch_shape, n, m) if has_yvar else None
        means = stats[:, 0, :].reshape(*batch_shape, 1, m)
        stdvs = stats[:, 1, :].reshape(*batch_shape, 1, m)
    else:
        def _unflatten(a2):
            return jnp.swapaxes(a2.reshape(n, B, m), 0, 1).reshape(*batch_shape, n, m)

        Y_tf = _unflatten(ytf_big)
        Yvar_tf = _unflatten(yvtf_big) if has_yvar else None
        means = stats[0, :].reshape(*batch_shape, 1, m)
        stdvs = stats[1, :].reshape(*batch_shape, 1, m)
    return Y_tf, Yvar_tf, means, stdvs


# --------------------------------------------------------------------------- #
# Tests
# --------------------------------------------------------------------------- #
if __name__ == "__main__":
    key = jax.random.PRNGKey(0)

    def _ref(Y, Yvar, min_stdv=1e-8):
        n = Y.shape[-2]
        mean = jnp.mean(Y, axis=-2, keepdims=True)
        var = jnp.sum((Y - mean) ** 2, axis=-2, keepdims=True) / max(n - 1, 1)
        std = jnp.sqrt(var)
        std = jnp.where(std >= min_stdv, std, jnp.ones_like(std))
        Y_tf = (Y - mean) / std
        Yvar_tf = None if Yvar is None else Yvar / (std ** 2)
        return Y_tf, Yvar_tf, mean, std

    def _check(out, ref, tol):
        Y_tf, Yvar_tf, means, stdvs = out
        rY, rV, rm, rs = ref
        assert jnp.allclose(Y_tf, rY, atol=tol, rtol=tol)
        assert jnp.allclose(means, rm, atol=tol, rtol=tol)
        assert jnp.allclose(stdvs, rs, atol=tol, rtol=tol)
        if rV is None:
            assert Yvar_tf is None
        else:
            assert jnp.allclose(Yvar_tf, rV, atol=tol, rtol=tol)

    # 1) small m -> flattened lane-dense path, with Yvar  (batch=2, n=16, m=8)
    k1, k2 = jax.random.split(key)
    Y = jax.random.normal(k1, (2, 16, 8), dtype=jnp.float32) * 3.0 + 1.5
    Yvar = jax.random.uniform(k2, (2, 16, 8), dtype=jnp.float32) + 0.1
    out = standardize_forward(Y, Yvar, min_stdv=1e-8)
    jax.block_until_ready([o for o in out if o is not None])
    _check(out, _ref(Y, Yvar), 1e-5)

    # 2) Yvar = None path
    out = standardize_forward(Y, None, min_stdv=1e-8)
    jax.block_until_ready([o for o in out if o is not None])
    _check(out, _ref(Y, None), 1e-5)

    # 3) m >= 128 -> native (B, n, m) layout (no transpose / pad copies)
    k3, k4 = jax.random.split(k1)
    Yn = jax.random.normal(k3, (2, 8, 256), dtype=jnp.float32) * 2.0 - 0.5
    Yvn = jax.random.uniform(k4, (2, 8, 256), dtype=jnp.float32) + 0.05
    out = standardize_forward(Yn, Yvn, min_stdv=1e-8)
    jax.block_until_ready([o for o in out if o is not None])
    _check(out, _ref(Yn, Yvn), 1e-5)

    # 4) forced large-n chunked path with a partial (masked) last n chunk
    k5, k6 = jax.random.split(k3)
    Yc = jax.random.normal(k5, (2, 40, 128), dtype=jnp.float32) * 3.0 + 1.5
    Yvc = jax.random.uniform(k6, (2, 40, 128), dtype=jnp.float32) + 0.1
    out = standardize_forward(Yc, Yvc, min_stdv=1e-8,
                              force_chunked_n=True, n_block=16)
    jax.block_until_ready([o for o in out if o is not None])
    _check(out, _ref(Yc, Yvc), 1e-4)

    print("KERNEL_OK")
</pallas_src>

<mosaic_0001>
module attributes {stable_mosaic.version = 11 : i64} {
  func.func @_standardize_fused_kernel(%arg0: i32, %arg1: memref<16x16xf32, #tpu.memory_space<vmem>>, %arg2: memref<16x16xf32, #tpu.memory_space<vmem>>, %arg3: memref<16x16xf32, #tpu.memory_space<vmem>>, %arg4: memref<16x16xf32, #tpu.memory_space<vmem>>, %arg5: memref<2x16xf32, #tpu.memory_space<vmem>>) attributes {dimension_semantics = [#tpu.dimension_semantics<parallel>], iteration_bounds = array<i64: 1>, scalar_prefetch = 0 : i64, scratch_operands = 0 : i64, tpu.core_type = #tpu.core_type<tc>, window_params = [{transform_indices = @transform_0, window_bounds = array<i64: 16, 16>}, {transform_indices = @transform_1, window_bounds = array<i64: 16, 16>}, {transform_indices = @transform_2, window_bounds = array<i64: 16, 16>}, {transform_indices = @transform_3, window_bounds = array<i64: 16, 16>}, {transform_indices = @transform_4, window_bounds = array<i64: 2, 16>}]} {
    %c0 = arith.constant 0 : index
    %c0_0 = arith.constant 0 : index
    %0 = vector.load %arg1[%c0, %c0_0] : memref<16x16xf32, #tpu.memory_space<vmem>>, vector<16x16xf32>
    %cst = arith.constant dense<0.000000e+00> : vector<16xf32>
    %1 = vector.multi_reduction <add>, %0, %cst [0] : vector<16x16xf32> to vector<16xf32>
    %2 = vector.shape_cast %1 : vector<16xf32> to vector<1x16xf32>
    %cst_1 = arith.constant 1.600000e+01 : f32
    %3 = vector.broadcast %cst_1 : f32 to vector<1x16xf32>
    %4 = arith.divf %2, %3 : vector<1x16xf32>
    %5 = vector.broadcast %4 : vector<1x16xf32> to vector<16x16xf32>
    %6 = arith.subf %0, %5 : vector<16x16xf32>
    %7 = arith.mulf %6, %6 : vector<16x16xf32>
    %cst_2 = arith.constant dense<0.000000e+00> : vector<16xf32>
    %8 = vector.multi_reduction <add>, %7, %cst_2 [0] : vector<16x16xf32> to vector<16xf32>
    %9 = vector.shape_cast %8 : vector<16xf32> to vector<1x16xf32>
    %cst_3 = arith.constant 0.0666666701 : f32
    %10 = vector.broadcast %cst_3 : f32 to vector<1x16xf32>
    %11 = arith.mulf %9, %10 : vector<1x16xf32>
    %12 = math.sqrt %11 : vector<1x16xf32>
    %cst_4 = arith.constant 9.99999993E-9 : f32
    %13 = vector.broadcast %cst_4 : f32 to vector<1x16xf32>
    %14 = arith.cmpf oge, %12, %13 : vector<1x16xf32>
    %cst_5 = arith.constant 1.000000e+00 : f32
    %15 = vector.broadcast %cst_5 : f32 to vector<1x16xf32>
    %16 = arith.select %14, %12, %15 : vector<1x16xi1>, vector<1x16xf32>
    %17 = tpu.reciprocal %16 : vector<1x16xf32> -> vector<1x16xf32>
    %18 = vector.broadcast %17 : vector<1x16xf32> to vector<16x16xf32>
    %19 = arith.mulf %6, %18 : vector<16x16xf32>
    %c0_6 = arith.constant 0 : index
    %c0_7 = arith.constant 0 : index
    %20 = vector.load %arg3[%c0_6, %c0_7] : memref<16x16xf32, #tpu.memory_space<vmem>>, vector<16x16xf32>
    tpu.vector_store %arg3[%c0_6, %c0_7], %19 {strides = array<i32>} : memref<16x16xf32, #tpu.memory_space<vmem>>, vector<16x16xf32>,
    %c0_8 = arith.constant 0 : index
    %c0_9 = arith.constant 0 : index
    %21 = vector.load %arg2[%c0_8, %c0_9] : memref<16x16xf32, #tpu.memory_space<vmem>>, vector<16x16xf32>
    %22 = arith.mulf %17, %17 : vector<1x16xf32>
    %23 = vector.broadcast %22 : vector<1x16xf32> to vector<16x16xf32>
    %24 = arith.mulf %21, %23 : vector<16x16xf32>
    %c0_10 = arith.constant 0 : index
    %c0_11 = arith.constant 0 : index
    %25 = vector.load %arg4[%c0_10, %c0_11] : memref<16x16xf32, #tpu.memory_space<vmem>>, vector<16x16xf32>
    tpu.vector_store %arg4[%c0_10, %c0_11], %24 {strides = array<i32>} : memref<16x16xf32, #tpu.memory_space<vmem>>, vector<16x16xf32>,
    %c0_12 = arith.constant 0 : index
    %c0_13 = arith.constant 0 : index
    %26 = vector.load %arg5[%c0_12, %c0_13] : memref<2x16xf32, #tpu.memory_space<vmem>>, vector<1x16xf32>
    tpu.vector_store %arg5[%c0_12, %c0_13], %4 {strides = array<i32>} : memref<2x16xf32, #tpu.memory_space<vmem>>, vector<1x16xf32>,
    %c1 = arith.constant 1 : index
    %c0_14 = arith.constant 0 : index
    %27 = vector.load %arg5[%c1, %c0_14] : memref<2x16xf32, #tpu.memory_space<vmem>>, vector<1x16xf32>
    tpu.vector_store %arg5[%c1, %c0_14], %16 {strides = array<i32>} : memref<2x16xf32, #tpu.memory_space<vmem>>, vector<1x16xf32>,
    return
  }
  func.func @transform_0(%arg0: i32) -> (i32, i32) {
    %c0_i32 = arith.constant 0 : i32
    %c0_i32_0 = arith.constant 0 : i32
    return %c0_i32, %arg0 : i32, i32
  }
  func.func @transform_1(%arg0: i32) -> (i32, i32) {
    %c0_i32 = arith.constant 0 : i32
    %c0_i32_0 = arith.constant 0 : i32
    return %c0_i32, %arg0 : i32, i32
  }
  func.func @transform_2(%arg0: i32) -> (i32, i32) {
    %c0_i32 = arith.constant 0 : i32
    %c0_i32_0 = arith.constant 0 : i32
    return %c0_i32, %arg0 : i32, i32
  }
  func.func @transform_3(%arg0: i32) -> (i32, i32) {
    %c0_i32 = arith.constant 0 : i32
    %c0_i32_0 = arith.constant 0 : i32
    return %c0_i32, %arg0 : i32, i32
  }
  func.func @transform_4(%arg0: i32) -> (i32, i32) {
    %c0_i32 = arith.constant 0 : i32
    %c0_i32_0 = arith.constant 0 : i32
    return %c0_i32, %arg0 : i32, i32
  }
}

</mosaic_0001>

<bundles_post_ra>
// kernel: tpu_custom_call.1
= control target key start
LH: loop header
LB: loop body
LE: loop exit
PB: predicated region body
PF: predicated region fallthrough
CT: control target
= control target key end

     0   :  { %10 = vsyncpa [#allocation3], 0  ;;  %s331_s0 = inlined_call_operand.hbm [shape: f32[16,16], index: 0, kind: input, shape index: {}]   ;;  %s332_s1 = inlined_call_operand.hbm [shape: f32[16,16], index: 1, kind: input, shape index: {}]   ;;  %s333_s2 = inlined_call_operand.hbm [shape: f32[16,16], index: 2, kind: output, shape index: {0}]   ;;  %s334_s3 = inlined_call_operand.hbm [shape: f32[16,16], index: 3, kind: output, shape index: {1}]   ;;  %s335_s4 = inlined_call_operand.hbm [shape: f32[2,16], index: 4, kind: output, shape index: {2}]  }
   0x1   :  { %11 = vsyncpa [#allocation6], 0 }
   0x2   :  { %12 = vsyncpa [#allocation4], 0 }
   0x3   :  { %13 = vsyncpa [#allocation9], 0  ;;  %s262_s15 = smov [#allocation2]  }
   0x4   :  { %s19_s16 = sshll.u32 %s262_s15, 4  ;;  %s20_s16 = int_to_ptr.vmem [resolvable:$true] %s19_s16 }
   0x5   :  { %s162_s17 = scalar_lea.vmem %s20_s16, 256  ;;  %p167_p1 = scmp.lt.s32.totalorder %s20_s16, %s20_s16 }
   0x6   :  { %p163_p0 = scmp.ne.s32.totalorder %s20_s16, %s162_s17  ;;  %p168_p2 = scmp.lt.s32.totalorder %s162_s17, %s162_s17 }
   0x8   :  { %p169_p3 = por %p168_p2, %p167_p1 }
   0xa   :  { %p170_p4 = pnand %p169_p3, %p163_p0 }
   0xc   :  { %173 = shalt.err (!%p170_p4)
}
   0xd   :  { %s263_s18 = smov 128   ;;  %s264_s19 = smov 8  }
   0xe   :  { %25 = dma.hbm_to_vmem [thread:$0]  %s331_s0, 256, %s20_s16, [#allocation3], %s263_s18, %s263_s18, %s264_s19  }
   0xf   :  { %s265_s22 = smov [#allocation5]  }
  0x10   :  { %s31_s23 = sshll.u32 %s265_s22, 4  ;;  %s32_s23 = int_to_ptr.vmem [resolvable:$true] %s31_s23 }
  0x11   :  { %s182_s24 = scalar_lea.vmem %s32_s23, 256  ;;  %p187_p6 = scmp.lt.s32.totalorder %s32_s23, %s32_s23 }
  0x12   :  { %p183_p5 = scmp.ne.s32.totalorder %s32_s23, %s182_s24  ;;  %p188_p7 = scmp.lt.s32.totalorder %s182_s24, %s182_s24 }
  0x14   :  { %p189_p8 = por %p188_p7, %p187_p6 }
  0x16   :  { %p190_p9 = pnand %p189_p8, %p183_p5 }
  0x18   :  { %193 = shalt.err (!%p190_p9)
}
  0x19   :  { %37 = dma.hbm_to_vmem [thread:$0]  %s332_s1, 256, %s32_s23, [#allocation6], %s263_s18, %s263_s18, %s264_s19  }
  0x1a   :  { %254 = dma.done.wait [#allocation3], 256  }
  0x1b   :  { %255 = vsyncadd [#allocation3], 4294967040 }
  0x1c   :  { %256 = dma.done.wait [#allocation6], 256  }
  0x1d   :  { %257 = vsyncadd [#allocation6], 4294967040  ;;  %vm46_vm0 = vcmask 130048   ;;  %v44_v0 = vld [vmem:[#allocation2] sm:$0xff]  ;;  %v45_v1 = vld [vmem:[#allocation2 + $0x8] sm:$0xff]  ;;  %vm93_vm1 = vcmask 122880  }
  0x1e   :  { %v47_v2 = vsel %vm46_vm0, %v44_v0, 0.0  ;;  %v48_v3 = vsel %vm46_vm0, %v45_v1, 0.0  ;;  %s266_s0 = smov [#allocation7]   ;;  %v86_v33 = vld [vmem:[#allocation5] sm:$0xff]  ;;  %v87_v34 = vld [vmem:[#allocation5 + $0x8] sm:$0xff]  ;;  %s267_s27 = smov [#allocation8]  }
  0x1f   :  { %v49_v4 = vadd.f32 %v48_v3, %v47_v2  ;;  %s101_s1 = sshll.u32 %s266_s0, 4  ;;  %s113_s28 = sshll.u32 %s267_s27, 4  ;;  %s102_s1 = int_to_ptr.vmem [resolvable:$true] %s101_s1  ;;  %s114_s28 = int_to_ptr.vmem [resolvable:$true] %s113_s28 }
  0x20   :  { %s268_s29 = smov [#allocation10]   ;;  %s194_s5 = scalar_lea.vmem %s102_s1, 256 }
  0x21   :  { %v50_v5 = vrot.slane %v49_v4, 4  ;;  %s126_s30 = sshll.u32 %s268_s29, 4  ;;  %p195_p10 = scmp.ne.s32.totalorder %s102_s1, %s194_s5  ;;  %s127_s30 = int_to_ptr.vmem [resolvable:$true] %s126_s30 }
  0x22   :  { %p199_p11 = scmp.lt.s32.totalorder %s102_s1, %s102_s1  ;;  %p200_p12 = scmp.lt.s32.totalorder %s194_s5, %s194_s5 }
  0x23   :  { %v51_v6 = vadd.f32 %v50_v5, %v49_v4 }
  0x24   :  { %p201_p13 = por %p200_p12, %p199_p11 }
  0x25   :  { %v52_v7 = vrot.slane %v51_v6, 2 }
  0x26   :  { %p202_p0 = pnand %p201_p13, %p195_p10 }
  0x27   :  { %v53_v8 = vadd.f32 %v52_v7, %v51_v6 }
  0x29   :  { %v54_v9 = vrot.slane %v53_v8, 1 }
  0x2b   :  { %v55_v10 = vadd.f32 %v54_v9, %v53_v8 }
  0x2d   :  { %v57_v11 = vmul.f32 0.0625, %v55_v10 }
  0x2f   :  { %v58_v12 = vsub.f32 %v44_v0, %v57_v11  ;;  %v59_v13 = vsub.f32 %v45_v1, %v57_v11  ;;  %94 = vst.msk [vmem:[#allocation10] sm:$0x1] %vm93_vm1, %v57_v11 }
  0x31   :  { %v60_v14 = vmul.f32 %v58_v12, %v58_v12  ;;  %v61_v15 = vmul.f32 %v59_v13, %v59_v13 }
  0x33   :  { %v62_v16 = vsel %vm46_vm0, %v60_v14, 0.0  ;;  %v63_v17 = vsel %vm46_vm0, %v61_v15, 0.0 }
  0x34   :  { %v64_v18 = vadd.f32 %v63_v17, %v62_v16 }
  0x36   :  { %v65_v19 = vrot.slane %v64_v18, 4 }
  0x38   :  { %v66_v20 = vadd.f32 %v65_v19, %v64_v18 }
  0x3a   :  { %v67_v21 = vrot.slane %v66_v20, 2 }
  0x3c   :  { %v68_v22 = vadd.f32 %v67_v21, %v66_v20 }
  0x3e   :  { %v69_v23 = vrot.slane %v68_v22, 1 }
  0x40   :  { %v70_v24 = vadd.f32 %v69_v23, %v68_v22 }
  0x42   :  { %v71_v25 = vmul.f32 0.06666667, %v70_v24 }
  0x44   :  { %150 = vrsqrt.f32 %v71_v25  ;;  %vm74_vm2 = vcmp.eq.f32.partialorder %v71_v25, inf  ;;  %v77_v27 = vand.u32 2147483648, %v71_v25  ;;  %vm76_vm3 = vcmp.eq.f32.partialorder %v71_v25, 0.0 }
  0x51   :  { %v151_v26 = vpop.eup %150 }
  0x52   :  { %v73_v28 = vmul.f32 %v151_v26, %v71_v25 }
  0x54   :  { %v75_v29 = vsel %vm74_vm2, %v71_v25, %v73_v28 }
  0x55   :  { %v78_v30 = vsel %vm76_vm3, %v77_v27, %v75_v29 }
  0x56   :  { %vm79_vm4 = vcmp.ge.f32.partialorder %v78_v30, 1e-08 }
  0x57   :  { %v80_v31 = vsel %vm79_vm4, %v78_v30, 1.0 }
  0x58   :  { %152 = vrcp.f32 %v80_v31  ;;  %95 = vst.msk [vmem:[#allocation10 + $0x1] sm:$0x1] %vm93_vm1, %v80_v31 }
  0x65   :  { %v153_v32 = vpop.eup %152 }
  0x66   :  { %v88_v35 = vmul.f32 %v153_v32, %v153_v32  ;;  %v82_v36 = vmul.f32 %v153_v32, %v58_v12  ;;  %v83_v37 = vmul.f32 %v153_v32, %v59_v13 }
  0x68   :  { %v89_v38 = vmul.f32 %v88_v35, %v86_v33  ;;  %v90_v39 = vmul.f32 %v88_v35, %v87_v34  ;;  %84 = vst.msk [vmem:[#allocation7] sm:$0xff] %vm46_vm0, %v82_v36  ;;  %85 = vst.msk [vmem:[#allocation7 + $0x8] sm:$0xff] %vm46_vm0, %v83_v37 }
  0x69   :  { %205 = shalt.err (!%p202_p0)
}
  0x6a   :  { %107 = dma.vmem_to_hbm [thread:$0]  %s102_s1, 256, %s333_s2, [#allocation4], %s263_s18, %s263_s18, %s264_s19   ;;  %91 = vst.msk [vmem:[#allocation8] sm:$0xff] %vm46_vm0, %v89_v38  ;;  %92 = vst.msk [vmem:[#allocation8 + $0x8] sm:$0xff] %vm46_vm0, %v90_v39 }
  0x6b   :  { %s214_s8 = scalar_lea.vmem %s114_s28, 256  ;;  %p219_p2 = scmp.lt.s32.totalorder %s114_s28, %s114_s28 }
  0x6c   :  { %p215_p1 = scmp.ne.s32.totalorder %s114_s28, %s214_s8  ;;  %p220_p3 = scmp.lt.s32.totalorder %s214_s8, %s214_s8 }
  0x6e   :  { %p221_p4 = por %p220_p3, %p219_p2 }
  0x70   :  { %p222_p5 = pnand %p221_p4, %p215_p1 }
  0x72   :  { %225 = shalt.err (!%p222_p5)
}
  0x73   :  { %119 = dma.vmem_to_hbm [thread:$0]  %s114_s28, 256, %s334_s3, [#allocation9], %s263_s18, %s263_s18, %s264_s19  }
  0x74   :  { %s234_s11 = scalar_lea.vmem %s127_s30, 32  ;;  %p239_p7 = scmp.lt.s32.totalorder %s127_s30, %s127_s30 }
  0x75   :  { %p235_p6 = scmp.ne.s32.totalorder %s127_s30, %s234_s11  ;;  %p240_p8 = scmp.lt.s32.totalorder %s234_s11, %s234_s11 }
  0x77   :  { %p241_p9 = por %p240_p8, %p239_p7 }
  0x79   :  { %p242_p10 = pnand %p241_p9, %p235_p6 }
  0x7b   :  { %245 = shalt.err (!%p242_p10)
}
  0x7c   :  { %129 = dma.vmem_to_hbm [thread:$0]  %s127_s30, 32, %s335_s4, [#allocation9]  }
  0x7d   :  { %258 = dma.done.wait [#allocation4], 256  }
  0x7e   :  { %259 = vsyncadd [#allocation4], 4294967040 }
  0x7f   :  { %260 = dma.done.wait [#allocation9], 288  }
  0x80   :  { %261 = vsyncadd [#allocation9], 4294967008 }
  0x81   :  { %139 = vsyncpa [#allocation3], 1 }
  0x82   :  { %140 = vsyncpa [#allocation6], 1 }
  0x83   :  { %141 = vsyncpa [#allocation4], 1 }
  0x84   :  { %142 = vsyncpa [#allocation9], 1 }

</bundles_post_ra>
